<compile_context>
chip_gen: v7x
topology: tpu7x:2x2x1
jax: 0.10.0
libtpu: 0.0.40
codegen_flags: <defaults>
</compile_context>

<pallas_src>
import functools
import math

import jax
import jax.numpy as jnp
from jax.experimental import pallas as pl
from jax.experimental.pallas import tpu as pltpu


def _num_tensorcores_per_chip():
    """Best-effort query of TensorCores per chip (2 on v7x-style megacore)."""
    try:
        info = pltpu.get_tpu_info()
        for name in ("num_cores", "num_tensorcores", "tensorcore_count",
                     "core_count"):
            v = getattr(info, name, None)
            if isinstance(v, int) and v >= 1:
                return max(1, min(int(v), 2))
    except Exception:
        pass
    return 1


def _sce_loss_kernel(logits_ref, labels_ref, out_ref, acc_ref, *,
                     alpha, beta, num_classes, label_smooth,
                     n_valid, tile_n, tiles_per_split, need_mask):
    s = pl.program_id(0)          # split (TensorCore) index
    i = pl.program_id(1)          # tile index within the split

    @pl.when(i == 0)
    def _():
        acc_ref[...] = jnp.zeros_like(acc_ref)

    logits = logits_ref[...].astype(jnp.float32)            # (C, T), class-major
    labels = labels_ref[...]                                  # (1, T) int32
    c, t = logits.shape

    # label "one-hot" as a boolean compare against a sublane iota (no gather,
    # no f32 one-hot materialisation).
    class_ids = jax.lax.broadcasted_iota(jnp.int32, (c, t), 0)
    hit = class_ids == labels                                 # (C, T) bool

    # Single exp pass: numerically stable logsumexp over the class (sublane) axis.
    col_max = jnp.max(logits, axis=0, keepdims=True)          # (1, T)
    shifted = logits - col_max                                 # (C, T), reused
    sum_exp = jnp.sum(jnp.exp(shifted), axis=0, keepdims=True)
    lse = jnp.log(sum_exp)                                     # (1, T)
    shifted_y = jnp.sum(jnp.where(hit, shifted, 0.0), axis=0, keepdims=True)
    nll_y = lse - shifted_y                                    # -log p_y, (1, T)

    eps = label_smooth
    if eps == 0.0:
        ce_per = nll_y
    else:
        # torch CrossEntropyLoss(label_smoothing=eps):
        #   -((1-eps) log p_y + (eps/C) sum_j log p_j)
        sum_shifted = jnp.sum(shifted, axis=0, keepdims=True)
        ce_per = ((1.0 - eps) * nll_y
                  + eps * lse
                  - (eps / num_classes) * sum_shifted)

    # Reverse cross entropy: after clip(label_one_hot, 1e-4, 1.0) the targets
    # take only two Python-time constant values, so
    #   rce = -(p_y * log(hit_val) + (1 - p_y) * log(miss_val)).
    # (The reference also clips p >= 1e-7 first; the difference is
    #  <= (C-1)*1e-7*|log(1e-4)| per row and is negligible.)
    if eps == 0.0:
        hit_val, miss_val = 1.0, 0.0
    else:
        # TODO(synk): smooth_one_hot() is undefined in the reference source;
        # assuming conventional (1-eps) on-target / eps/(C-1) off-target.
        hit_val, miss_val = 1.0 - eps, eps / (num_classes - 1)
    log_hit = math.log(min(max(hit_val, 1e-4), 1.0))
    log_miss = math.log(min(max(miss_val, 1e-4), 1.0))

    p_y = jnp.exp(-nll_y)                                      # (1, T)
    if log_hit == 0.0:
        rce_per = (-log_miss) * (1.0 - p_y)
    else:
        rce_per = -(p_y * log_hit + (1.0 - p_y) * log_miss)

    per_col = alpha * ce_per + beta * rce_per                  # (1, T)

    if need_mask:
        # Zero out columns past the real batch (ragged boundary block and any
        # fully out-of-range clamped tiles).  Must happen before acc/reduce.
        tile_idx = s * tiles_per_split + i
        col_ids = tile_idx * tile_n + jax.lax.broadcasted_iota(jnp.int32, (1, t), 1)
        per_col = jnp.where(col_ids < n_valid, per_col, 0.0)

    # Lane-dense partial accumulation (pure VALU add, no per-step XLU reduce).
    acc_ref[...] += per_col

    @pl.when(i == tiles_per_split - 1)
    def _():
        out_ref[...] = jnp.sum(acc_ref[...]).reshape(1, 1, 1)


def sce_loss(pred, labels, *, alpha, beta, num_classes=10, label_smooth=0.0,
             tile_n=131072, num_splits=None, pred_is_class_major=False):
    """pred: (N, C) float logits (f32 or bf16) -- or (C, N) if
    pred_is_class_major=True; labels: (N,) int class ids.  Returns scalar loss."""
    if pred_is_class_major:
        c, n = pred.shape
        logits_t = pred
    else:
        n, c = pred.shape
        logits_t = pred.T                 # one XLA HBM pass; avoidable upstream
    assert c == num_classes

    labels_row = labels.astype(jnp.int32).reshape(1, n)
    # TODO(synk): labels could be narrowed to int8/uint16 for ~10% HBM savings.

    # Lane-aligned batch tile (big tiles amortise per-grid-step overhead).
    if n <= tile_n:
        tile = n                                              # single full block
    else:
        tile = max(128, (tile_n // 128) * 128)
    num_tiles = pl.cdiv(n, tile)

    # Optional dual-TensorCore split (v7x).  Harmless (sequential) on 1-TC chips.
    if num_splits is None:
        num_splits = _num_tensorcores_per_chip()
    num_splits = max(1, min(int(num_splits), num_tiles))
    tiles_per_split = pl.cdiv(num_tiles, num_splits)

    # Mask needed whenever the logical grid coverage exceeds the real batch.
    need_mask = (num_splits * tiles_per_split * tile) != n

    last_block = num_tiles - 1

    def tile_index(s, i):
        # Clamp logical tile index so the DMA never targets a fully
        # out-of-bounds block; duplicated tiles are fully masked in-kernel.
        return jnp.minimum(s * tiles_per_split + i, last_block)

    kernel = functools.partial(
        _sce_loss_kernel,
        alpha=float(alpha), beta=float(beta),
        num_classes=int(num_classes), label_smooth=float(label_smooth),
        n_valid=n, tile_n=tile, tiles_per_split=tiles_per_split,
        need_mask=need_mask)

    partials = pl.pallas_call(
        kernel,
        out_shape=jax.ShapeDtypeStruct((num_splits, 1, 1), jnp.float32),
        grid=(num_splits, tiles_per_split),
        in_specs=[
            pl.BlockSpec((c, tile), lambda s, i: (0, tile_index(s, i))),   # logits
            pl.BlockSpec((1, tile), lambda s, i: (0, tile_index(s, i))),   # labels
        ],
        out_specs=pl.BlockSpec((1, 1, 1), lambda s, i: (s, 0, 0)),
        scratch_shapes=[pltpu.VMEM((1, tile), jnp.float32)],               # acc
        compiler_params=pltpu.CompilerParams(
            dimension_semantics=("parallel", "arbitrary"),
            vmem_limit_bytes=48 * 1024 * 1024),
    )(logits_t, labels_row)

    return jnp.sum(partials) * (1.0 / n)


def _sce_loss_ref(pred, labels, *, alpha, beta, num_classes=10, label_smooth=0.0):
    """Pure-JAX reference mirroring the PyTorch forward (label_smooth == 0)."""
    pred = pred.astype(jnp.float32)
    log_p = jax.nn.log_softmax(pred, axis=1)
    one_hot = jax.nn.one_hot(labels, num_classes, dtype=jnp.float32)
    ce = -jnp.mean(jnp.sum(one_hot * log_p, axis=1))
    p = jnp.clip(jax.nn.softmax(pred, axis=1), 1e-7, 1.0)
    loh = jnp.clip(one_hot, 1e-4, 1.0)
    rce = jnp.mean(-jnp.sum(p * jnp.log(loh), axis=1))
    return alpha * ce + beta * rce


if __name__ == "__main__":
    key = jax.random.PRNGKey(0)
    k1, k2, k3, k4 = jax.random.split(key, 4)

    num_classes = 10
    alpha, beta, label_smooth = 0.1, 1.0, 0.0

    # Small single-tile case (default tile / auto split detection).
    batch = 8
    pred = jax.random.normal(k1, (batch, num_classes), dtype=jnp.float32)
    labels = jax.random.randint(k2, (batch,), 0, num_classes, dtype=jnp.int32)
    loss = sce_loss(pred, labels, alpha=alpha, beta=beta,
                    num_classes=num_classes, label_smooth=label_smooth)
    loss = jax.block_until_ready(loss)
    ref = _sce_loss_ref(pred, labels, alpha=alpha, beta=beta,
                        num_classes=num_classes, label_smooth=label_smooth)
    assert jnp.allclose(loss, ref, rtol=1e-5, atol=1e-5), (loss, ref)

    # Multi-tile case exercising the 2-D grid, the ragged (unpadded) last
    # block, the clamped out-of-range tile, and the dual-core split path.
    batch2 = 300
    pred2 = jax.random.normal(k3, (batch2, num_classes), dtype=jnp.float32)
    labels2 = jax.random.randint(k4, (batch2,), 0, num_classes, dtype=jnp.int32)
    loss2 = sce_loss(pred2, labels2, alpha=alpha, beta=beta,
                     num_classes=num_classes, label_smooth=label_smooth,
                     tile_n=128, num_splits=2)
    loss2 = jax.block_until_ready(loss2)
    ref2 = _sce_loss_ref(pred2, labels2, alpha=alpha, beta=beta,
                         num_classes=num_classes, label_smooth=label_smooth)
    assert jnp.allclose(loss2, ref2, rtol=1e-5, atol=1e-5), (loss2, ref2)

    print("KERNEL_OK")
</pallas_src>

<mosaic_0001>
module attributes {stable_mosaic.version = 11 : i64} {
  func.func @_sce_loss_kernel(%arg0: i32, %arg1: i32, %arg2: memref<10x8xf32, #tpu.memory_space<vmem>>, %arg3: memref<1x8xi32, #tpu.memory_space<vmem>>, %arg4: memref<1x1x1xf32, #tpu.memory_space<vmem>>, %arg5: memref<1x8xf32, #tpu.memory_space<vmem>>) attributes {dimension_semantics = [#tpu.dimension_semantics<parallel>, #tpu.dimension_semantics<arbitrary>], iteration_bounds = array<i64: 1, 1>, scalar_prefetch = 0 : i64, scratch_operands = 1 : i64, tpu.core_type = #tpu.core_type<tc>, window_params = [{transform_indices = @transform_0, window_bounds = array<i64: 10, 8>}, {transform_indices = @transform_1, window_bounds = array<i64: 1, 8>}, {transform_indices = @transform_2, window_bounds = array<i64: 1, 1, 1>}]} {
    %c0_i32 = arith.constant 0 : i32
    %0 = arith.cmpi eq, %arg1, %c0_i32 : i32
    %1 = arith.extui %0 : i1 to i32
    %c0_i32_0 = arith.constant 0 : i32
    %2 = arith.cmpi ne, %1, %c0_i32_0 : i32
    scf.if %2 {
      %cst_18 = arith.constant 0.000000e+00 : f32
      %39 = vector.broadcast %cst_18 : f32 to vector<1x8xf32>
      %c0_19 = arith.constant 0 : index
      %c0_20 = arith.constant 0 : index
      %40 = vector.load %arg5[%c0_19, %c0_20] : memref<1x8xf32, #tpu.memory_space<vmem>>, vector<1x8xf32>
      tpu.vector_store %arg5[%c0_19, %c0_20], %39 {strides = array<i32>} : memref<1x8xf32, #tpu.memory_space<vmem>>, vector<1x8xf32>,
    } else {
    }
    %c0 = arith.constant 0 : index
    %c0_1 = arith.constant 0 : index
    %3 = vector.load %arg2[%c0, %c0_1] : memref<10x8xf32, #tpu.memory_space<vmem>>, vector<10x8xf32>
    %c0_2 = arith.constant 0 : index
    %c0_3 = arith.constant 0 : index
    %4 = vector.load %arg3[%c0_2, %c0_3] : memref<1x8xi32, #tpu.memory_space<vmem>>, vector<1x8xi32>
    %5 = tpu.iota {dimensions = array<i32: 0>} : vector<10x8xi32>
    %6 = vector.broadcast %4 : vector<1x8xi32> to vector<10x8xi32>
    %7 = arith.cmpi eq, %5, %6 : vector<10x8xi32>
    %cst = arith.constant dense<0xFF800000> : vector<8xf32>
    %8 = vector.multi_reduction <maximumf>, %3, %cst [0] : vector<10x8xf32> to vector<8xf32>
    %9 = vector.shape_cast %8 : vector<8xf32> to vector<1x8xf32>
    %10 = vector.broadcast %9 : vector<1x8xf32> to vector<10x8xf32>
    %11 = arith.subf %3, %10 : vector<10x8xf32>
    %12 = math.exp %11 : vector<10x8xf32>
    %cst_4 = arith.constant dense<0.000000e+00> : vector<8xf32>
    %13 = vector.multi_reduction <add>, %12, %cst_4 [0] : vector<10x8xf32> to vector<8xf32>
    %14 = vector.shape_cast %13 : vector<8xf32> to vector<1x8xf32>
    %15 = math.log %14 : vector<1x8xf32>
    %cst_5 = arith.constant 0.000000e+00 : f32
    %16 = vector.broadcast %cst_5 : f32 to vector<10x8xf32>
    %17 = arith.select %7, %11, %16 : vector<10x8xi1>, vector<10x8xf32>
    %cst_6 = arith.constant dense<0.000000e+00> : vector<8xf32>
    %18 = vector.multi_reduction <add>, %17, %cst_6 [0] : vector<10x8xf32> to vector<8xf32>
    %19 = vector.shape_cast %18 : vector<8xf32> to vector<1x8xf32>
    %20 = arith.subf %15, %19 : vector<1x8xf32>
    %cst_7 = arith.constant 0.000000e+00 : f32
    %21 = vector.broadcast %cst_7 : f32 to vector<1x8xf32>
    %22 = arith.subf %21, %20 : vector<1x8xf32>
    %23 = math.exp %22 : vector<1x8xf32>
    %cst_8 = arith.constant 1.000000e+00 : f32
    %24 = vector.broadcast %cst_8 : f32 to vector<1x8xf32>
    %25 = arith.subf %24, %23 : vector<1x8xf32>
    %cst_9 = arith.constant 9.21034049 : f32
    %26 = vector.broadcast %cst_9 : f32 to vector<1x8xf32>
    %27 = arith.mulf %26, %25 : vector<1x8xf32>
    %cst_10 = arith.constant 1.000000e-01 : f32
    %28 = vector.broadcast %cst_10 : f32 to vector<1x8xf32>
    %29 = arith.mulf %28, %20 : vector<1x8xf32>
    %cst_11 = arith.constant 1.000000e+00 : f32
    %30 = vector.broadcast %cst_11 : f32 to vector<1x8xf32>
    %31 = arith.mulf %30, %27 : vector<1x8xf32>
    %32 = arith.addf %29, %31 : vector<1x8xf32>
    %c0_12 = arith.constant 0 : index
    %c0_13 = arith.constant 0 : index
    %33 = vector.load %arg5[%c0_12, %c0_13] : memref<1x8xf32, #tpu.memory_space<vmem>>, vector<1x8xf32>
    %34 = arith.addf %33, %32 : vector<1x8xf32>
    %c0_14 = arith.constant 0 : index
    %c0_15 = arith.constant 0 : index
    %35 = vector.load %arg5[%c0_14, %c0_15] : memref<1x8xf32, #tpu.memory_space<vmem>>, vector<1x8xf32>
    tpu.vector_store %arg5[%c0_14, %c0_15], %34 {strides = array<i32>} : memref<1x8xf32, #tpu.memory_space<vmem>>, vector<1x8xf32>,
    %c0_i32_16 = arith.constant 0 : i32
    %36 = arith.cmpi eq, %arg1, %c0_i32_16 : i32
    %37 = arith.extui %36 : i1 to i32
    %c0_i32_17 = arith.constant 0 : i32
    %38 = arith.cmpi ne, %37, %c0_i32_17 : i32
    scf.if %38 {
      %c0_18 = arith.constant 0 : index
      %c0_19 = arith.constant 0 : index
      %39 = vector.load %arg5[%c0_18, %c0_19] : memref<1x8xf32, #tpu.memory_space<vmem>>, vector<1x8xf32>
      %40 = vector.shape_cast %39 : vector<1x8xf32> to vector<1x1x8xf32>
      %cst_20 = arith.constant dense<0.000000e+00> : vector<1xf32>
      %41 = vector.multi_reduction <add>, %40, %cst_20 [1, 2] : vector<1x1x8xf32> to vector<1xf32>
      %42 = vector.shape_cast %41 : vector<1xf32> to vector<1x1x1xf32>
      %43 = vector.extract %42[0, 0, 0] : f32 from vector<1x1x1xf32>
      %44 = vector.broadcast %43 : f32 to vector<1x1x1xf32>
      %c0_21 = arith.constant 0 : index
      %c0_22 = arith.constant 0 : index
      %c0_23 = arith.constant 0 : index
      %45 = vector.load %arg4[%c0_21, %c0_22, %c0_23] : memref<1x1x1xf32, #tpu.memory_space<vmem>>, vector<1x1x1xf32>
      tpu.vector_store %arg4[%c0_21, %c0_22, %c0_23], %44 {strides = array<i32>} : memref<1x1x1xf32, #tpu.memory_space<vmem>>, vector<1x1x1xf32>,
    } else {
    }
    return
  }
  func.func @transform_0(%arg0: i32, %arg1: i32) -> (i32, i32) {
    %c1_i32 = arith.constant 1 : i32
    %0 = arith.muli %arg0, %c1_i32 : i32
    %1 = arith.addi %0, %arg1 : i32
    %c0_i32 = arith.constant 0 : i32
    %2 = arith.minsi %1, %c0_i32 : i32
    %c0_i32_0 = arith.constant 0 : i32
    %c0_i32_1 = arith.constant 0 : i32
    return %c0_i32_0, %2 : i32, i32
  }
  func.func @transform_1(%arg0: i32, %arg1: i32) -> (i32, i32) {
    %c1_i32 = arith.constant 1 : i32
    %0 = arith.muli %arg0, %c1_i32 : i32
    %1 = arith.addi %0, %arg1 : i32
    %c0_i32 = arith.constant 0 : i32
    %2 = arith.minsi %1, %c0_i32 : i32
    %c0_i32_0 = arith.constant 0 : i32
    %c0_i32_1 = arith.constant 0 : i32
    return %c0_i32_0, %2 : i32, i32
  }
  func.func @transform_2(%arg0: i32, %arg1: i32) -> (i32, i32, i32) {
    %c0_i32 = arith.constant 0 : i32
    %c0_i32_0 = arith.constant 0 : i32
    %c0_i32_1 = arith.constant 0 : i32
    return %arg0, %c0_i32, %c0_i32_0 : i32, i32, i32
  }
}

</mosaic_0001>

<bundles_post_ra>
// kernel: tpu_custom_call.1
= control target key start
LH: loop header
LB: loop body
LE: loop exit
PB: predicated region body
PF: predicated region fallthrough
CT: control target
= control target key end

     0   :  { %vm67_vm0 = vcmask 57344   ;;  %vm81_vm1 = vcmask 64512   ;;  %v209_v2 = vmov 0.0   ;;  %vm83_vm2 = vcmask 58368   ;;  %s256_s0 = inlined_call_operand.vmem [shape: f32[10,8], index: 0, kind: input, shape index: {}]   ;;  %s257_s1 = inlined_call_operand.vmem [shape: s32[1,8], index: 1, kind: input, shape index: {}]   ;;  %s258_s2 = inlined_call_operand.hbm [shape: f32[1,1,1], index: 2, kind: output, shape index: {}]  }
   0x1   :  { %v69_v0 = vld [vmem:[%s256_s0] sm:$0xff]  ;;  %v70_v1 = vld [vmem:[%s256_s0 + $0x8] sm:$0x3]  ;;  %68 = vst.msk [vmem:[#allocation2] sm:$0x1] %vm67_vm0, %v209_v2 }
   0x2   :  { %v82_v3 = vsel %vm81_vm1, %v69_v0, -inf }
   0x3   :  { %7 = vsyncpa [#allocation4], 0  ;;  %v84_v4 = vsel %vm83_vm2, %v70_v1, -inf  ;;  %v72_v10 = vlaneseq  ;;  %v172_v19 = vld [vmem:[%s257_s1] ss:$0 sm:$0xff]  ;;  %s210_s1 = smov [#allocation3]  }
   0x4   :  { %v85_v5 = vmax.f32 %v82_v3, %v84_v4  ;;  %s155_s14 = sshll.u32 %s210_s1, 4  ;;  %vm147_vm5 = vcmask 0   ;;  %s156_s14 = int_to_ptr.vmem [resolvable:$true] %s155_s14 }
   0x5   :  { %v73_v13 = vshrl.u32 %v72_v10, 7  ;;  %s185_s16 = scalar_lea.vmem %s156_s14, 16  ;;  %s189_s17 = scalar_lea.vmem %s156_s14, 32 }
   0x6   :  { %v86_v6 = vrot.slane %v85_v5, 4  ;;  %p186_p0 = scmp.ne.s32.totalorder %s156_s14, %s185_s16  ;;  %p190_p1 = scmp.lt.s32.totalorder %s156_s14, %s156_s14 }
   0x7   :  { %v74_v18 = vadd.s32 8, %v73_v13  ;;  %vm79_vm3 = vcmp.eq.s32.totalorder %v73_v13, %v172_v19  ;;  %p191_p2 = scmp.lt.s32.totalorder %s189_s17, %s185_s16 }
   0x8   :  { %v87_v7 = vmax.f32 %v85_v5, %v86_v6  ;;  %v128_v51 = vld [vmem:[#allocation2] sm:$0x1] }
   0x9   :  { %vm80_vm4 = vcmp.eq.s32.totalorder %v74_v18, %v172_v19  ;;  %p192_p3 = por %p191_p2, %p190_p1 }
   0xa   :  { %v88_v8 = vrot.slane %v87_v7, 2 }
   0xb   :  { %p193_p4 = pnand %p192_p3, %p186_p0 }
   0xc   :  { %v89_v9 = vmax.f32 %v87_v7, %v88_v8 }
   0xe   :  { %v90_v11 = vrot.slane %v89_v9, 1 }
  0x10   :  { %v91_v12 = vmax.f32 %v89_v9, %v90_v11 }
  0x12   :  { %v92_v14 = vsub.f32 %v69_v0, %v91_v12  ;;  %v93_v15 = vsub.f32 %v70_v1, %v91_v12 }
  0x14   :  { %v94_v16 = vmul.f32 1.442695, %v92_v14  ;;  %v96_v17 = vmul.f32 1.442695, %v93_v15  ;;  %v109_v20 = vsel %vm79_vm3, %v92_v14, 0.0  ;;  %v110_v21 = vsel %vm80_vm4, %v93_v15, 0.0 }
  0x15   :  { %v111_v22 = vsel %vm81_vm1, %v109_v20, 0.0  ;;  %v112_v23 = vsel %vm83_vm2, %v110_v21, 0.0 }
  0x16   :  { %177 = vpow2.f32 %v94_v16  ;;  %v113_v28 = vadd.f32 %v112_v23, %v111_v22 }
  0x17   :  { %179 = vpow2.f32 %v96_v17 }
  0x18   :  { %v114_v31 = vrot.slane %v113_v28, 4 }
  0x1a   :  { %v115_v34 = vadd.f32 %v114_v31, %v113_v28 }
  0x1c   :  { %v116_v37 = vrot.slane %v115_v34, 2 }
  0x1e   :  { %v117_v39 = vadd.f32 %v116_v37, %v115_v34 }
  0x20   :  { %v178_v24 = vpop.eup %177  ;;  %v118_v40 = vrot.slane %v117_v39, 1 }
  0x21   :  { %v180_v25 = vpop.eup %179  ;;  %v98_v26 = vsel %vm81_vm1, %v178_v24, 0.0 }
  0x22   :  { %v99_v27 = vsel %vm83_vm2, %v180_v25, 0.0  ;;  %v119_v41 = vadd.f32 %v118_v40, %v117_v39 }
  0x23   :  { %v100_v29 = vadd.f32 %v99_v27, %v98_v26 }
  0x25   :  { %v101_v30 = vrot.slane %v100_v29, 4 }
  0x27   :  { %v102_v32 = vadd.f32 %v101_v30, %v100_v29 }
  0x29   :  { %v103_v33 = vrot.slane %v102_v32, 2 }
  0x2b   :  { %v104_v35 = vadd.f32 %v103_v33, %v102_v32 }
  0x2d   :  { %v105_v36 = vrot.slane %v104_v35, 1 }
  0x2f   :  { %v106_v38 = vadd.f32 %v105_v36, %v104_v35 }
  0x31   :  { %181 = vlog2.f32 %v106_v38 }
  0x3b   :  { %v182_v42 = vpop.eup %181 }
  0x3c   :  { %v108_v43 = vmul.f32 0.6931472, %v182_v42 }
  0x3e   :  { %v120_v44 = vsub.f32 %v108_v43, %v119_v41 }
  0x40   :  { %v121_v45 = vsub.f32 0.0, %v120_v44  ;;  %v126_v49 = vmul.f32 0.1, %v120_v44 }
  0x42   :  { %v122_v46 = vmul.f32 1.442695, %v121_v45 }
  0x44   :  { %183 = vpow2.f32 %v122_v46 }
  0x4e   :  { %v184_v47 = vpop.eup %183 }
  0x4f   :  { %v124_v48 = vsub.f32 1.0, %v184_v47 }
  0x51   :  { %v125_v50 = vmul.f32 9.2103405, %v124_v48 }
  0x53   :  { %v127_v52 = vadd.f32 %v126_v49, %v125_v50 }
  0x55   :  { %v129_v53 = vadd.f32 %v128_v51, %v127_v52 }
  0x57   :  { %131 = vst.msk [vmem:[#allocation2] sm:$0x1] %vm67_vm0, %v129_v53 }
  0x5e   :  { %v135_v54 = vld [vmem:[#allocation2] sm:$0x1] }
  0x5f   :  { %v136_v55 = vsel %vm67_vm0, %v135_v54, 0.0 }
  0x60   :  { %137 = vadd.xlane.f32.xlu0 %v136_v55 }
  0xed   :  { %v138_v56 = vpop.xlane.xlu0 %137 }
  0xee   :  { %v139_v57 = vrot.slane %v138_v56, 4 }
  0xf0   :  { %v140_v58 = vadd.f32 %v139_v57, %v138_v56 }
  0xf2   :  { %v141_v59 = vrot.slane %v140_v58, 2 }
  0xf4   :  { %v142_v60 = vadd.f32 %v141_v59, %v140_v58 }
  0xf6   :  { %v143_v61 = vrot.slane %v142_v60, 1 }
  0xf8   :  { %v144_v62 = vadd.f32 %v143_v61, %v142_v60 }
  0xfa   :  { %173 = vpush %v144_v62 }
 0x12b   :  { %s174_s15 = spop %173 }
 0x12c   :  { %v146_v63 = vstv %s174_s15 }
 0x12d   :  { %148 = vst.msk [vmem:[#allocation3] sm:$0x1] %vm147_vm5, %v146_v63 }
 0x12e   :  { %196 = shalt.err (!%p193_p4)
}
 0x12f   :  { %s197_s20 = scalar_lea.hbm %s258_s2, 16 }
 0x130   :  { %p198_p5 = scmp.ne.s32.totalorder %s258_s2, %s197_s20  ;;  %p201_p6 = scmp.lt.u32.totalorder %s197_s20, %s258_s2 }
 0x132   :  { %p203_p7 = pnand %p201_p6, %p198_p5 }
 0x134   :  { %206 = shalt.err (!%p203_p7)
}
 0x135   :  { %158 = dma.vmem_to_hbm [thread:$0]  %s156_s14, 16, %s258_s2, [#allocation4]  }
 0x136   :  { %207 = dma.done.wait [#allocation4], 16  }
 0x137   :  { %208 = vsyncadd [#allocation4], 4294967280 }
 0x138   :  { %162 = vsyncpa [#allocation4], 1 }

</bundles_post_ra>
